<compile_context>
chip_gen: v7x
topology: tpu7x:2x2x1
jax: 0.10.0
libtpu: 0.0.40
codegen_flags: <defaults>
</compile_context>

<pallas_src>
import functools

import jax
import jax.numpy as jnp
from jax.experimental import pallas as pl
from jax.experimental.pallas import tpu as pltpu

LEAK = 0.1
EPS = 1e-5


def _leaky(x):
    # leaky_relu(x, 0.1) without compare+select.
    return jnp.maximum(x, LEAK * x)


def _vmem_capacity_bytes():
    """Physical VMEM per core; conservative fallback if the query fails."""
    try:
        cap = int(pltpu.get_tpu_info().vmem_capacity_bytes)
        if cap > 0:
            return cap
    except Exception:
        pass
    return 64 << 20     # v7x per-TC size: safe lower bound for all generations


# ---------------------------------------------------------------------------
# Fused, fully VMEM-resident forward (single grid step, single kernel).
# ---------------------------------------------------------------------------
def _fused_kernel(x_ref, w1_ref, w2_ref, g1_ref, b1_ref, g2_ref, b2_ref,
                  out_ref, *, cf):
    N, H, W = x_ref.shape
    Wm = W - cf

    # Hoist every SMEM scalar read once (JAX does not CSE broadcast_in_dim).
    w1_00 = w1_ref[0, 0]; w1_01 = w1_ref[0, 1]
    w1_10 = w1_ref[1, 0]; w1_11 = w1_ref[1, 1]
    w2_00 = w2_ref[0, 0]; w2_01 = w2_ref[0, 1]
    w2_10 = w2_ref[1, 0]; w2_11 = w2_ref[1, 1]
    g1_0 = g1_ref[0]; g1_1 = g1_ref[1]
    b1_0 = b1_ref[0]; b1_1 = b1_ref[1]
    g2_0 = g2_ref[0]; b2_0 = b2_ref[0]

    # Slice the MRI columns in-kernel (static lane window starting at cf):
    # avoids an XLA slice copy of the volume through HBM.
    xm = x_ref[:, :, pl.ds(cf, Wm)]                  # (N, H, Wm)
    xt = xm[:, : H - 1, :]                           # rows h
    xb = xm[:, 1:, :]                                # rows h + 1

    # conv1 (1 -> 2 channels, kernel [2,1], no bias)
    y0 = w1_00 * xt + w1_01 * xb                     # (N, H-1, Wm)
    y1 = w1_10 * xt + w1_11 * xb

    # bn1 batch statistics: two-pass (mean-subtracted) variance.
    inv1 = 1.0 / float(N * (H - 1) * Wm)
    m0 = jnp.sum(y0) * inv1
    m1 = jnp.sum(y1) * inv1
    v0 = jnp.sum((y0 - m0) * (y0 - m0)) * inv1
    v1 = jnp.sum((y1 - m1) * (y1 - m1)) * inv1
    s0 = g1_0 * jax.lax.rsqrt(v0 + EPS); t0 = b1_0 - m0 * s0
    s1 = g1_1 * jax.lax.rsqrt(v1 + EPS); t1 = b1_1 - m1 * s1

    # bn1 + leaky computed ONCE over H-1 rows; conv2 uses shifted views.
    a0 = _leaky(y0 * s0 + t0)                        # (N, H-1, Wm)
    a1 = _leaky(y1 * s1 + t1)

    # conv2 (2 -> 1 channel, kernel [2,1], no bias)
    z = (w2_00 * a0[:, : H - 2, :] + w2_01 * a0[:, 1:, :]
         + w2_10 * a1[:, : H - 2, :] + w2_11 * a1[:, 1:, :])   # (N, H-2, Wm)

    # bn2 batch statistics (two-pass) + leaky, write output.
    inv2 = 1.0 / float(N * (H - 2) * Wm)
    mz = jnp.sum(z) * inv2
    vz = jnp.sum((z - mz) * (z - mz)) * inv2
    sz = g2_0 * jax.lax.rsqrt(vz + EPS); tz = b2_0 - mz * sz
    out_ref[...] = _leaky(z * sz + tz)


def _fused_forward(x3, params, cf, vmem_limit):
    N, H, W = x3.shape
    Wm = W - cf
    smem = pl.BlockSpec(memory_space=pltpu.MemorySpace.SMEM)
    return pl.pallas_call(
        functools.partial(_fused_kernel, cf=cf),
        out_shape=jax.ShapeDtypeStruct((N, H - 2, Wm), jnp.float32),
        grid=(1,),
        in_specs=[pl.BlockSpec((N, H, W), lambda i: (0, 0, 0)),
                  smem, smem, smem, smem, smem, smem],
        out_specs=pl.BlockSpec((N, H - 2, Wm), lambda i: (0, 0, 0)),
        compiler_params=pltpu.CompilerParams(
            dimension_semantics=("arbitrary",),
            vmem_limit_bytes=vmem_limit),
    )(x3, params["w1"], params["w2"], params["g1"], params["b1"],
      params["g2"], params["b2"])


# ---------------------------------------------------------------------------
# Streamed fallback: batch-blocked, three passes (bn1 stats, bn2 stats, out).
# ---------------------------------------------------------------------------
def _stream_bn1_stats(x_ref, w1_ref, sums_ref, *, cf):
    # x_ref: (H, W) one batch; sums_ref: (8, 128) per-batch partial stats.
    H, W = x_ref.shape
    Wm = W - cf
    w00 = w1_ref[0, 0]; w01 = w1_ref[0, 1]
    w10 = w1_ref[1, 0]; w11 = w1_ref[1, 1]
    xm = x_ref[:, pl.ds(cf, Wm)]
    xt = xm[: H - 1, :]
    xb = xm[1:, :]
    y0 = w00 * xt + w01 * xb
    y1 = w10 * xt + w11 * xb
    # Reduce to scalars in-kernel (XLU is idle; the pass is DMA-bound) and
    # write one small unmasked (8,128) block instead of (4, L) per-lane sums.
    sums_ref[...] = jnp.concatenate(
        [jnp.full((1, 128), jnp.sum(y0), jnp.float32),
         jnp.full((1, 128), jnp.sum(y0 * y0), jnp.float32),
         jnp.full((1, 128), jnp.sum(y1), jnp.float32),
         jnp.full((1, 128), jnp.sum(y1 * y1), jnp.float32),
         jnp.zeros((4, 128), jnp.float32)], axis=0)


def _stream_conv_stack(x_ref, w1_ref, w2_ref, bn1_ref, *, cf):
    # conv1 -> folded bn1 -> leaky (computed once over H-1 rows) -> conv2.
    H, W = x_ref.shape
    Wm = W - cf
    w1_00 = w1_ref[0, 0]; w1_01 = w1_ref[0, 1]
    w1_10 = w1_ref[1, 0]; w1_11 = w1_ref[1, 1]
    w2_00 = w2_ref[0, 0]; w2_01 = w2_ref[0, 1]
    w2_10 = w2_ref[1, 0]; w2_11 = w2_ref[1, 1]
    s0 = bn1_ref[0]; t0 = bn1_ref[1]
    s1 = bn1_ref[2]; t1 = bn1_ref[3]
    xm = x_ref[:, pl.ds(cf, Wm)]
    xt = xm[: H - 1, :]
    xb = xm[1:, :]
    a0 = _leaky((w1_00 * xt + w1_01 * xb) * s0 + t0)     # (H-1, Wm), once
    a1 = _leaky((w1_10 * xt + w1_11 * xb) * s1 + t1)
    return (w2_00 * a0[: H - 2, :] + w2_01 * a0[1:, :]
            + w2_10 * a1[: H - 2, :] + w2_11 * a1[1:, :])   # (H-2, Wm)


def _stream_bn2_stats(x_ref, w1_ref, w2_ref, bn1_ref, sums_ref, *, cf):
    z = _stream_conv_stack(x_ref, w1_ref, w2_ref, bn1_ref, cf=cf)
    sums_ref[...] = jnp.concatenate(
        [jnp.full((1, 128), jnp.sum(z), jnp.float32),
         jnp.full((1, 128), jnp.sum(z * z), jnp.float32),
         jnp.zeros((6, 128), jnp.float32)], axis=0)


def _stream_output(x_ref, w1_ref, w2_ref, bn1_ref, bn2_ref, out_ref, *, cf):
    z = _stream_conv_stack(x_ref, w1_ref, w2_ref, bn1_ref, cf=cf)
    out_ref[...] = _leaky(z * bn2_ref[0] + bn2_ref[1])


def _streamed_forward(x3, params, cf, vmem_limit):
    N, H, W = x3.shape
    Wm = W - cf
    w1, w2 = params["w1"], params["w2"]
    g1, b1 = params["g1"], params["b1"]
    g2, b2 = params["g2"], params["b2"]

    smem = pl.BlockSpec(memory_space=pltpu.MemorySpace.SMEM)
    x_spec = pl.BlockSpec((None, H, W), lambda n: (n, 0, 0))
    stats_spec = pl.BlockSpec((None, 8, 128), lambda n: (n, 0, 0))
    cparams = pltpu.CompilerParams(dimension_semantics=("parallel",),
                                   vmem_limit_bytes=vmem_limit)
    # TODO(synk): if a single (H, W) plane ever exceeds the VMEM budget, add a
    # width-tiling grid axis here; not needed for realistic MRI plane sizes.

    # ---- pass 1: bn1 batch statistics ----------------------------------
    stats1 = pl.pallas_call(
        functools.partial(_stream_bn1_stats, cf=cf),
        out_shape=jax.ShapeDtypeStruct((N, 8, 128), jnp.float32),
        grid=(N,),
        in_specs=[x_spec, smem],
        out_specs=stats_spec,
        compiler_params=cparams,
    )(x3, w1)

    cnt1 = float(N * (H - 1) * Wm)
    sA = jnp.sum(stats1[:, 0:4, 0], axis=0)        # tiny combine
    m0 = sA[0] / cnt1
    m1 = sA[2] / cnt1
    v0 = jnp.maximum(sA[1] / cnt1 - m0 * m0, 0.0)  # clamp one-pass variance
    v1 = jnp.maximum(sA[3] / cnt1 - m1 * m1, 0.0)
    s0 = g1[0] * jax.lax.rsqrt(v0 + EPS)
    s1 = g1[1] * jax.lax.rsqrt(v1 + EPS)
    bn1 = jnp.stack([s0, b1[0] - m0 * s0, s1, b1[1] - m1 * s1])

    # ---- pass 2: bn2 batch statistics ----------------------------------
    stats2 = pl.pallas_call(
        functools.partial(_stream_bn2_stats, cf=cf),
        out_shape=jax.ShapeDtypeStruct((N, 8, 128), jnp.float32),
        grid=(N,),
        in_specs=[x_spec, smem, smem, smem],
        out_specs=stats_spec,
        compiler_params=cparams,
    )(x3, w1, w2, bn1)

    cnt2 = float(N * (H - 2) * Wm)
    sB = jnp.sum(stats2[:, 0:2, 0], axis=0)
    mz = sB[0] / cnt2
    vz = jnp.maximum(sB[1] / cnt2 - mz * mz, 0.0)
    sz = g2[0] * jax.lax.rsqrt(vz + EPS)
    bn2 = jnp.stack([sz, b2[0] - mz * sz])

    # ---- pass 3: normalized, activated output --------------------------
    return pl.pallas_call(
        functools.partial(_stream_output, cf=cf),
        out_shape=jax.ShapeDtypeStruct((N, H - 2, Wm), jnp.float32),
        grid=(N,),
        in_specs=[x_spec, smem, smem, smem, smem],
        out_specs=pl.BlockSpec((None, H - 2, Wm), lambda n: (n, 0, 0)),
        compiler_params=cparams,
    )(x3, w1, w2, bn1, bn2)


# ---------------------------------------------------------------------------
# Wrapper
# ---------------------------------------------------------------------------
def longitudinal_cnn3_forward(inputs, params, clinical_feature_num, *,
                              force_streamed=False):
    """inputs: (N, 1, H, W) float32 (NCHW, C=1) like the PyTorch module."""
    N, C, H, W = inputs.shape
    assert C == 1 and H >= 3
    cf = clinical_feature_num
    Wm = W - cf
    assert Wm >= 1

    clinical = inputs[:, 0, 0, :cf]                  # (N, cf)
    x3 = inputs.reshape(N, H, W)                     # free (C == 1), no copy

    # Generation-aware VMEM budgeting (v7x: 64 MiB, v5e/v6e: 128 MiB).
    cap = _vmem_capacity_bytes()
    vmem_limit = int(min(cap * 0.78, 100 << 20))
    plane_bytes = 4 * N * H * Wm
    # residency estimate: double-buffered in/out blocks + ~6 live temporaries
    fused_bytes = 2 * 4 * N * H * W + 2 * 4 * N * (H - 2) * Wm + 6 * plane_bytes
    use_fused = (not force_streamed) and fused_bytes <= int(cap * 0.40)

    if use_fused:
        out = _fused_forward(x3, params, cf, vmem_limit)
    else:
        out = _streamed_forward(x3, params, cf, vmem_limit)

    return clinical, out[:, None, :, :]              # (N, 1, H-2, Wm)


# ---------------------------------------------------------------------------
# Pure-JAX reference mirroring the PyTorch math (training-mode BatchNorm).
# ---------------------------------------------------------------------------
def _reference(inputs, params, cf):
    x = inputs[:, 0, :, cf:]
    xt, xb = x[:, :-1, :], x[:, 1:, :]
    w1, w2 = params["w1"], params["w2"]
    ys = [w1[k, 0] * xt + w1[k, 1] * xb for k in range(2)]

    def bn(y, g, b):
        m = jnp.mean(y)
        v = jnp.mean((y - m) ** 2)
        return (y - m) / jnp.sqrt(v + EPS) * g + b

    acts = [jnp.where(t >= 0, t, LEAK * t)
            for t in (bn(ys[0], params["g1"][0], params["b1"][0]),
                      bn(ys[1], params["g1"][1], params["b1"][1]))]
    z = sum(w2[k, 0] * acts[k][:, :-1, :] + w2[k, 1] * acts[k][:, 1:, :]
            for k in range(2))
    z = bn(z, params["g2"][0], params["b2"][0])
    z = jnp.where(z >= 0, z, LEAK * z)
    clinical = inputs[:, 0, 0, 0:cf]
    return clinical, z[:, None, :, :]


if __name__ == "__main__":
    key = jax.random.PRNGKey(0)
    k_in, k_w1, k_w2, k_in2 = jax.random.split(key, 4)

    # conv1.weight (2,1,2,1) -> (2,2); conv2.weight (1,2,2,1) -> (2,2).
    params = {
        "w1": jax.random.normal(k_w1, (2, 2), dtype=jnp.float32) * 0.5,
        "w2": jax.random.normal(k_w2, (2, 2), dtype=jnp.float32) * 0.5,
        "g1": jnp.ones((2,), jnp.float32),   # BatchNorm2d(2) weight init
        "b1": jnp.zeros((2,), jnp.float32),  # BatchNorm2d(2) bias init
        "g2": jnp.ones((1,), jnp.float32),   # BatchNorm2d(1) weight init
        "b2": jnp.zeros((1,), jnp.float32),  # BatchNorm2d(1) bias init
    }

    fwd = jax.jit(longitudinal_cnn3_forward, static_argnums=(2,))
    fwd_streamed = jax.jit(
        functools.partial(longitudinal_cnn3_forward, force_streamed=True),
        static_argnums=(2,))

    # ---- test 1: small shapes -> fused single-kernel path ----------------
    N, H, cf, Wm = 2, 16, 4, 16
    inputs = jax.random.normal(k_in, (N, 1, H, cf + Wm), dtype=jnp.float32)
    clinical, xout = fwd(inputs, params, cf)
    jax.block_until_ready((clinical, xout))
    ref_clin, ref_x = _reference(inputs, params, cf)
    assert clinical.shape == (N, cf)
    assert xout.shape == (N, 1, H - 2, Wm)
    assert jnp.allclose(clinical, ref_clin, atol=1e-5, rtol=1e-5)
    assert jnp.allclose(xout, ref_x, atol=1e-4, rtol=1e-4)

    # ---- test 2: exercise the streamed batch-blocked fallback ------------
    N2, H2, cf2, Wm2 = 4, 12, 4, 200
    inputs2 = jax.random.normal(k_in2, (N2, 1, H2, cf2 + Wm2),
                                dtype=jnp.float32)
    clin2, xout2 = fwd_streamed(inputs2, params, cf2)
    jax.block_until_ready((clin2, xout2))
    ref_clin2, ref_x2 = _reference(inputs2, params, cf2)
    assert clin2.shape == (N2, cf2)
    assert xout2.shape == (N2, 1, H2 - 2, Wm2)
    assert jnp.allclose(clin2, ref_clin2, atol=1e-5, rtol=1e-5)
    assert jnp.allclose(xout2, ref_x2, atol=1e-4, rtol=1e-4)

    print("KERNEL_OK")
</pallas_src>

<mosaic_0001>
module attributes {stable_mosaic.version = 11 : i64} {
  func.func @_fused_kernel(%arg0: i32, %arg1: memref<2x16x20xf32, #tpu.memory_space<vmem>>, %arg2: memref<2x2xf32, #tpu.memory_space<smem>>, %arg3: memref<2x2xf32, #tpu.memory_space<smem>>, %arg4: memref<2xf32, #tpu.memory_space<smem>>, %arg5: memref<2xf32, #tpu.memory_space<smem>>, %arg6: memref<1xf32, #tpu.memory_space<smem>>, %arg7: memref<1xf32, #tpu.memory_space<smem>>, %arg8: memref<2x14x16xf32, #tpu.memory_space<vmem>>) attributes {dimension_semantics = [#tpu.dimension_semantics<arbitrary>], iteration_bounds = array<i64: 1>, scalar_prefetch = 0 : i64, scratch_operands = 0 : i64, tpu.core_type = #tpu.core_type<tc>, window_params = [{pipeline_mode = #tpu.pipeline_mode<synchronous>, transform_indices = @transform_0, window_bounds = array<i64: 2, 16, 20>}, {transform_indices = @transform_1, window_bounds = array<i64: 2, 2>}, {transform_indices = @transform_2, window_bounds = array<i64: 2, 2>}, {transform_indices = @transform_3, window_bounds = array<i64: 2>}, {transform_indices = @transform_4, window_bounds = array<i64: 2>}, {transform_indices = @transform_5, window_bounds = array<i64: 1>}, {transform_indices = @transform_6, window_bounds = array<i64: 1>}, {pipeline_mode = #tpu.pipeline_mode<synchronous>, transform_indices = @transform_7, window_bounds = array<i64: 2, 14, 16>}]} {
    %c0 = arith.constant 0 : index
    %c0_0 = arith.constant 0 : index
    %0 = memref.load %arg2[%c0, %c0_0] : memref<2x2xf32, #tpu.memory_space<smem>>
    %c0_1 = arith.constant 0 : index
    %c1 = arith.constant 1 : index
    %1 = memref.load %arg2[%c0_1, %c1] : memref<2x2xf32, #tpu.memory_space<smem>>
    %c1_2 = arith.constant 1 : index
    %c0_3 = arith.constant 0 : index
    %2 = memref.load %arg2[%c1_2, %c0_3] : memref<2x2xf32, #tpu.memory_space<smem>>
    %c1_4 = arith.constant 1 : index
    %c1_5 = arith.constant 1 : index
    %3 = memref.load %arg2[%c1_4, %c1_5] : memref<2x2xf32, #tpu.memory_space<smem>>
    %c0_6 = arith.constant 0 : index
    %c0_7 = arith.constant 0 : index
    %4 = memref.load %arg3[%c0_6, %c0_7] : memref<2x2xf32, #tpu.memory_space<smem>>
    %c0_8 = arith.constant 0 : index
    %c1_9 = arith.constant 1 : index
    %5 = memref.load %arg3[%c0_8, %c1_9] : memref<2x2xf32, #tpu.memory_space<smem>>
    %c1_10 = arith.constant 1 : index
    %c0_11 = arith.constant 0 : index
    %6 = memref.load %arg3[%c1_10, %c0_11] : memref<2x2xf32, #tpu.memory_space<smem>>
    %c1_12 = arith.constant 1 : index
    %c1_13 = arith.constant 1 : index
    %7 = memref.load %arg3[%c1_12, %c1_13] : memref<2x2xf32, #tpu.memory_space<smem>>
    %c0_14 = arith.constant 0 : index
    %8 = memref.load %arg4[%c0_14] : memref<2xf32, #tpu.memory_space<smem>>
    %c1_15 = arith.constant 1 : index
    %9 = memref.load %arg4[%c1_15] : memref<2xf32, #tpu.memory_space<smem>>
    %c0_16 = arith.constant 0 : index
    %10 = memref.load %arg5[%c0_16] : memref<2xf32, #tpu.memory_space<smem>>
    %c1_17 = arith.constant 1 : index
    %11 = memref.load %arg5[%c1_17] : memref<2xf32, #tpu.memory_space<smem>>
    %c0_18 = arith.constant 0 : index
    %12 = memref.load %arg6[%c0_18] : memref<1xf32, #tpu.memory_space<smem>>
    %c0_19 = arith.constant 0 : index
    %13 = memref.load %arg7[%c0_19] : memref<1xf32, #tpu.memory_space<smem>>
    %c0_20 = arith.constant 0 : index
    %c0_21 = arith.constant 0 : index
    %c4 = arith.constant 4 : index
    %14 = vector.load %arg1[%c0_20, %c0_21, %c4] : memref<2x16x20xf32, #tpu.memory_space<vmem>>, vector<2x16x16xf32>
    %15 = vector.extract_strided_slice %14 {offsets = [0, 0, 0], sizes = [2, 15, 16], strides = [1, 1, 1]} : vector<2x16x16xf32> to vector<2x15x16xf32>
    %16 = vector.extract_strided_slice %14 {offsets = [0, 1, 0], sizes = [2, 15, 16], strides = [1, 1, 1]} : vector<2x16x16xf32> to vector<2x15x16xf32>
    %17 = vector.broadcast %0 : f32 to vector<2x15x16xf32>
    %18 = arith.mulf %17, %15 : vector<2x15x16xf32>
    %19 = vector.broadcast %1 : f32 to vector<2x15x16xf32>
    %20 = arith.mulf %19, %16 : vector<2x15x16xf32>
    %21 = arith.addf %18, %20 : vector<2x15x16xf32>
    %22 = vector.broadcast %2 : f32 to vector<2x15x16xf32>
    %23 = arith.mulf %22, %15 : vector<2x15x16xf32>
    %24 = vector.broadcast %3 : f32 to vector<2x15x16xf32>
    %25 = arith.mulf %24, %16 : vector<2x15x16xf32>
    %26 = arith.addf %23, %25 : vector<2x15x16xf32>
    %27 = vector.shape_cast %21 : vector<2x15x16xf32> to vector<1x2x15x16xf32>
    %cst = arith.constant dense<0.000000e+00> : vector<1xf32>
    %28 = vector.multi_reduction <add>, %27, %cst [1, 2, 3] : vector<1x2x15x16xf32> to vector<1xf32>
    %29 = vector.shape_cast %28 : vector<1xf32> to vector<1x1x1x1xf32>
    %30 = vector.extract %29[0, 0, 0, 0] : f32 from vector<1x1x1x1xf32>
    %cst_22 = arith.constant 0.00208333344 : f32
    %31 = arith.mulf %30, %cst_22 : f32
    %32 = vector.shape_cast %26 : vector<2x15x16xf32> to vector<1x2x15x16xf32>
    %cst_23 = arith.constant dense<0.000000e+00> : vector<1xf32>
    %33 = vector.multi_reduction <add>, %32, %cst_23 [1, 2, 3] : vector<1x2x15x16xf32> to vector<1xf32>
    %34 = vector.shape_cast %33 : vector<1xf32> to vector<1x1x1x1xf32>
    %35 = vector.extract %34[0, 0, 0, 0] : f32 from vector<1x1x1x1xf32>
    %cst_24 = arith.constant 0.00208333344 : f32
    %36 = arith.mulf %35, %cst_24 : f32
    %37 = vector.broadcast %31 : f32 to vector<2x15x16xf32>
    %38 = arith.subf %21, %37 : vector<2x15x16xf32>
    %39 = vector.broadcast %31 : f32 to vector<2x15x16xf32>
    %40 = arith.subf %21, %39 : vector<2x15x16xf32>
    %41 = arith.mulf %38, %40 : vector<2x15x16xf32>
    %42 = vector.shape_cast %41 : vector<2x15x16xf32> to vector<1x2x15x16xf32>
    %cst_25 = arith.constant dense<0.000000e+00> : vector<1xf32>
    %43 = vector.multi_reduction <add>, %42, %cst_25 [1, 2, 3] : vector<1x2x15x16xf32> to vector<1xf32>
    %44 = vector.shape_cast %43 : vector<1xf32> to vector<1x1x1x1xf32>
    %45 = vector.extract %44[0, 0, 0, 0] : f32 from vector<1x1x1x1xf32>
    %cst_26 = arith.constant 0.00208333344 : f32
    %46 = arith.mulf %45, %cst_26 : f32
    %47 = vector.broadcast %36 : f32 to vector<2x15x16xf32>
    %48 = arith.subf %26, %47 : vector<2x15x16xf32>
    %49 = vector.broadcast %36 : f32 to vector<2x15x16xf32>
    %50 = arith.subf %26, %49 : vector<2x15x16xf32>
    %51 = arith.mulf %48, %50 : vector<2x15x16xf32>
    %52 = vector.shape_cast %51 : vector<2x15x16xf32> to vector<1x2x15x16xf32>
    %cst_27 = arith.constant dense<0.000000e+00> : vector<1xf32>
    %53 = vector.multi_reduction <add>, %52, %cst_27 [1, 2, 3] : vector<1x2x15x16xf32> to vector<1xf32>
    %54 = vector.shape_cast %53 : vector<1xf32> to vector<1x1x1x1xf32>
    %55 = vector.extract %54[0, 0, 0, 0] : f32 from vector<1x1x1x1xf32>
    %cst_28 = arith.constant 0.00208333344 : f32
    %56 = arith.mulf %55, %cst_28 : f32
    %cst_29 = arith.constant 9.99999974E-6 : f32
    %57 = arith.addf %46, %cst_29 : f32
    %58 = math.rsqrt %57 : f32
    %59 = arith.mulf %8, %58 : f32
    %60 = arith.mulf %31, %59 : f32
    %61 = arith.subf %10, %60 : f32
    %cst_30 = arith.constant 9.99999974E-6 : f32
    %62 = arith.addf %56, %cst_30 : f32
    %63 = math.rsqrt %62 : f32
    %64 = arith.mulf %9, %63 : f32
    %65 = arith.mulf %36, %64 : f32
    %66 = arith.subf %11, %65 : f32
    %67 = vector.broadcast %59 : f32 to vector<2x15x16xf32>
    %68 = arith.mulf %21, %67 : vector<2x15x16xf32>
    %69 = vector.broadcast %61 : f32 to vector<2x15x16xf32>
    %70 = arith.addf %68, %69 : vector<2x15x16xf32>
    %cst_31 = arith.constant 1.000000e-01 : f32
    %71 = vector.broadcast %cst_31 : f32 to vector<2x15x16xf32>
    %72 = arith.mulf %71, %70 : vector<2x15x16xf32>
    %73 = arith.maximumf %70, %72 : vector<2x15x16xf32>
    %74 = vector.broadcast %64 : f32 to vector<2x15x16xf32>
    %75 = arith.mulf %26, %74 : vector<2x15x16xf32>
    %76 = vector.broadcast %66 : f32 to vector<2x15x16xf32>
    %77 = arith.addf %75, %76 : vector<2x15x16xf32>
    %cst_32 = arith.constant 1.000000e-01 : f32
    %78 = vector.broadcast %cst_32 : f32 to vector<2x15x16xf32>
    %79 = arith.mulf %78, %77 : vector<2x15x16xf32>
    %80 = arith.maximumf %77, %79 : vector<2x15x16xf32>
    %81 = vector.extract_strided_slice %73 {offsets = [0, 0, 0], sizes = [2, 14, 16], strides = [1, 1, 1]} : vector<2x15x16xf32> to vector<2x14x16xf32>
    %82 = vector.broadcast %4 : f32 to vector<2x14x16xf32>
    %83 = arith.mulf %82, %81 : vector<2x14x16xf32>
    %84 = vector.extract_strided_slice %73 {offsets = [0, 1, 0], sizes = [2, 14, 16], strides = [1, 1, 1]} : vector<2x15x16xf32> to vector<2x14x16xf32>
    %85 = vector.broadcast %5 : f32 to vector<2x14x16xf32>
    %86 = arith.mulf %85, %84 : vector<2x14x16xf32>
    %87 = arith.addf %83, %86 : vector<2x14x16xf32>
    %88 = vector.extract_strided_slice %80 {offsets = [0, 0, 0], sizes = [2, 14, 16], strides = [1, 1, 1]} : vector<2x15x16xf32> to vector<2x14x16xf32>
    %89 = vector.broadcast %6 : f32 to vector<2x14x16xf32>
    %90 = arith.mulf %89, %88 : vector<2x14x16xf32>
    %91 = arith.addf %87, %90 : vector<2x14x16xf32>
    %92 = vector.extract_strided_slice %80 {offsets = [0, 1, 0], sizes = [2, 14, 16], strides = [1, 1, 1]} : vector<2x15x16xf32> to vector<2x14x16xf32>
    %93 = vector.broadcast %7 : f32 to vector<2x14x16xf32>
    %94 = arith.mulf %93, %92 : vector<2x14x16xf32>
    %95 = arith.addf %91, %94 : vector<2x14x16xf32>
    %96 = vector.shape_cast %95 : vector<2x14x16xf32> to vector<1x2x14x16xf32>
    %cst_33 = arith.constant dense<0.000000e+00> : vector<1xf32>
    %97 = vector.multi_reduction <add>, %96, %cst_33 [1, 2, 3] : vector<1x2x14x16xf32> to vector<1xf32>
    %98 = vector.shape_cast %97 : vector<1xf32> to vector<1x1x1x1xf32>
    %99 = vector.extract %98[0, 0, 0, 0] : f32 from vector<1x1x1x1xf32>
    %cst_34 = arith.constant 0.00223214296 : f32
    %100 = arith.mulf %99, %cst_34 : f32
    %101 = vector.broadcast %100 : f32 to vector<2x14x16xf32>
    %102 = arith.subf %95, %101 : vector<2x14x16xf32>
    %103 = vector.broadcast %100 : f32 to vector<2x14x16xf32>
    %104 = arith.subf %95, %103 : vector<2x14x16xf32>
    %105 = arith.mulf %102, %104 : vector<2x14x16xf32>
    %106 = vector.shape_cast %105 : vector<2x14x16xf32> to vector<1x2x14x16xf32>
    %cst_35 = arith.constant dense<0.000000e+00> : vector<1xf32>
    %107 = vector.multi_reduction <add>, %106, %cst_35 [1, 2, 3] : vector<1x2x14x16xf32> to vector<1xf32>
    %108 = vector.shape_cast %107 : vector<1xf32> to vector<1x1x1x1xf32>
    %109 = vector.extract %108[0, 0, 0, 0] : f32 from vector<1x1x1x1xf32>
    %cst_36 = arith.constant 0.00223214296 : f32
    %110 = arith.mulf %109, %cst_36 : f32
    %cst_37 = arith.constant 9.99999974E-6 : f32
    %111 = arith.addf %110, %cst_37 : f32
    %112 = math.rsqrt %111 : f32
    %113 = arith.mulf %12, %112 : f32
    %114 = arith.mulf %100, %113 : f32
    %115 = arith.subf %13, %114 : f32
    %116 = vector.broadcast %113 : f32 to vector<2x14x16xf32>
    %117 = arith.mulf %95, %116 : vector<2x14x16xf32>
    %118 = vector.broadcast %115 : f32 to vector<2x14x16xf32>
    %119 = arith.addf %117, %118 : vector<2x14x16xf32>
    %cst_38 = arith.constant 1.000000e-01 : f32
    %120 = vector.broadcast %cst_38 : f32 to vector<2x14x16xf32>
    %121 = arith.mulf %120, %119 : vector<2x14x16xf32>
    %122 = arith.maximumf %119, %121 : vector<2x14x16xf32>
    %c0_39 = arith.constant 0 : index
    %c0_40 = arith.constant 0 : index
    %c0_41 = arith.constant 0 : index
    %123 = vector.load %arg8[%c0_39, %c0_40, %c0_41] : memref<2x14x16xf32, #tpu.memory_space<vmem>>, vector<2x14x16xf32>
    tpu.vector_store %arg8[%c0_39, %c0_40, %c0_41], %122 {strides = array<i32>} : memref<2x14x16xf32, #tpu.memory_space<vmem>>, vector<2x14x16xf32>,
    return
  }
  func.func @transform_0(%arg0: i32) -> (i32, i32, i32) {
    %c0_i32 = arith.constant 0 : i32
    %c0_i32_0 = arith.constant 0 : i32
    %c0_i32_1 = arith.constant 0 : i32
    %c0_i32_2 = arith.constant 0 : i32
    return %c0_i32, %c0_i32_0, %c0_i32_1 : i32, i32, i32
  }
  func.func @transform_1(%arg0: i32) -> (i32, i32) {
    %c0_i32 = arith.constant 0 : i32
    %c0_i32_0 = arith.constant 0 : i32
    %c0_i32_1 = arith.constant 0 : i32
    return %c0_i32, %c0_i32_0 : i32, i32
  }
  func.func @transform_2(%arg0: i32) -> (i32, i32) {
    %c0_i32 = arith.constant 0 : i32
    %c0_i32_0 = arith.constant 0 : i32
    %c0_i32_1 = arith.constant 0 : i32
    return %c0_i32, %c0_i32_0 : i32, i32
  }
  func.func @transform_3(%arg0: i32) -> i32 {
    %c0_i32 = arith.constant 0 : i32
    %c0_i32_0 = arith.constant 0 : i32
    return %c0_i32 : i32
  }
  func.func @transform_4(%arg0: i32) -> i32 {
    %c0_i32 = arith.constant 0 : i32
    %c0_i32_0 = arith.constant 0 : i32
    return %c0_i32 : i32
  }
  func.func @transform_5(%arg0: i32) -> i32 {
    %c0_i32 = arith.constant 0 : i32
    %c0_i32_0 = arith.constant 0 : i32
    return %c0_i32 : i32
  }
  func.func @transform_6(%arg0: i32) -> i32 {
    %c0_i32 = arith.constant 0 : i32
    %c0_i32_0 = arith.constant 0 : i32
    return %c0_i32 : i32
  }
  func.func @transform_7(%arg0: i32) -> (i32, i32, i32) {
    %c0_i32 = arith.constant 0 : i32
    %c0_i32_0 = arith.constant 0 : i32
    %c0_i32_1 = arith.constant 0 : i32
    %c0_i32_2 = arith.constant 0 : i32
    return %c0_i32, %c0_i32_0, %c0_i32_1 : i32, i32, i32
  }
}

</mosaic_0001>

<bundles_post_ra>
// kernel: longitudinal_cnn3_forward.1
= control target key start
LH: loop header
LB: loop body
LE: loop exit
PB: predicated region body
PF: predicated region fallthrough
CT: control target
= control target key end

     0   :  { %14 = vsyncpa [#allocation5], 0  ;;  %s912_s0 = inlined_call_operand.hbm [shape: f32[2,16,20], index: 0, kind: input, shape index: {}]   ;;  %s913_s1 = inlined_call_operand.vmem [shape: f32[2,2], index: 1, kind: input, shape index: {}]   ;;  %s914_s2 = inlined_call_operand.vmem [shape: f32[2,2], index: 2, kind: input, shape index: {}]   ;;  %s915_s3 = inlined_call_operand.vmem [shape: f32[2], index: 3, kind: input, shape index: {}]   ;;  %s916_s4 = inlined_call_operand.vmem [shape: f32[2], index: 4, kind: input, shape index: {}]   ;;  %s917_s5 = inlined_call_operand.<no memory space> [shape: f32[1], index: 5, kind: input, shape index: {}]   ;;  %s918_s6 = inlined_call_operand.<no memory space> [shape: f32[1], index: 6, kind: input, shape index: {}]   ;;  %s919_s7 = inlined_call_operand.vmem [shape: f32[2,14,16], index: 7, kind: output, shape index: {}]  }
   0x1   :  { %15 = vsyncpa [#allocation6], 0 }
   0x2   :  { %16 = vsyncpa [#allocation9], 0  ;;  %s46_s26 = sshll.u32 %s914_s2, 4  ;;  %s47_s26 = int_to_ptr.vmem [resolvable:$true] %s46_s26 }
   0x3   :  { %17 = vsyncpa [#allocation12], 0  ;;  %s596_s27 = scalar_lea.vmem %s47_s26, 32  ;;  %p601_p1 = scmp.lt.s32.totalorder %s47_s26, %s47_s26 }
   0x4   :  { %p597_p0 = scmp.ne.s32.totalorder %s47_s26, %s596_s27  ;;  %p602_p2 = scmp.lt.s32.totalorder %s596_s27, %s596_s27 }
   0x6   :  { %p603_p3 = por %p602_p2, %p601_p1 }
   0x8   :  { %p604_p4 = pnand %p603_p3, %p597_p0 }
   0xa   :  { %607 = shalt.err (!%p604_p4)
}
   0xb   :  { %s674_s28 = smov [#allocation8]   ;;  %s675_s29 = smov [#allocation4]  }
   0xc   :  { %49 = dma.vmem_to_smem %s47_s26, 32, %s674_s28, [#allocation9]  }
   0xd   :  { %s23_s30 = sshll.u32 %s675_s29, 4  ;;  %s608_s10 = scalar_lea.hbm %s912_s0, 512  ;;  %s24_s30 = int_to_ptr.vmem [resolvable:$true] %s23_s30 }
   0xe   :  { %p609_p5 = scmp.ne.s32.totalorder %s912_s0, %s608_s10  ;;  %p612_p6 = scmp.lt.u32.totalorder %s608_s10, %s912_s0 }
  0x10   :  { %p614_p7 = pnand %p612_p6, %p609_p5 }
  0x12   :  { %617 = shalt.err (!%p614_p7)
}
  0x13   :  { %s618_s14 = scalar_lea.vmem %s24_s30, 512  ;;  %p623_p9 = scmp.lt.s32.totalorder %s24_s30, %s24_s30 }
  0x14   :  { %p619_p8 = scmp.ne.s32.totalorder %s24_s30, %s618_s14  ;;  %p624_p10 = scmp.lt.s32.totalorder %s618_s14, %s618_s14 }
  0x16   :  { %p625_p11 = por %p624_p10, %p623_p9 }
  0x18   :  { %p626_p12 = pnand %p625_p11, %p619_p8 }
  0x1a   :  { %629 = shalt.err (!%p626_p12)
}
  0x1b   :  { %s676_s15 = smov 128   ;;  %s677_s16 = smov 8  }
  0x1c   :  { %29 = dma.hbm_to_vmem [thread:$0]  %s912_s0, 512, %s24_s30, [#allocation5], %s676_s15, %s676_s15, %s677_s16  }
  0x1d   :  { %s36_s21 = sshll.u32 %s913_s1, 4  ;;  %s56_s24 = sshll.u32 %s915_s3, 4  ;;  %s37_s21 = int_to_ptr.vmem [resolvable:$true] %s36_s21  ;;  %s57_s24 = int_to_ptr.vmem [resolvable:$true] %s56_s24 }
  0x1e   :  { %s630_s25 = scalar_lea.vmem %s37_s21, 32  ;;  %p635_p0 = scmp.lt.s32.totalorder %s37_s21, %s37_s21 }
  0x1f   :  { %p631_p13 = scmp.ne.s32.totalorder %s37_s21, %s630_s25  ;;  %p636_p1 = scmp.lt.s32.totalorder %s630_s25, %s630_s25 }
  0x21   :  { %p637_p2 = por %p636_p1, %p635_p0 }
  0x23   :  { %p638_p3 = pnand %p637_p2, %p631_p13 }
  0x25   :  { %641 = shalt.err (!%p638_p3)
}
  0x26   :  { %s678_s26 = smov [#allocation7]   ;;  %s642_s0 = scalar_lea.vmem %s57_s24, 16 }
  0x27   :  { %39 = dma.vmem_to_smem %s37_s21, 32, %s678_s26, [#allocation6]  }
  0x28   :  { %p643_p4 = scmp.ne.s32.totalorder %s57_s24, %s642_s0  ;;  %p647_p5 = scmp.lt.s32.totalorder %s57_s24, %s57_s24 }
  0x29   :  { %p648_p6 = scmp.lt.s32.totalorder %s642_s0, %s642_s0 }
  0x2b   :  { %p649_p7 = por %p648_p6, %p647_p5 }
  0x2d   :  { %p650_p8 = pnand %p649_p7, %p643_p4 }
  0x2f   :  { %653 = shalt.err (!%p650_p8)
}
  0x30   :  { %s679_s1 = smov [#allocation10]   ;;  %s66_s28 = sshll.u32 %s916_s4, 4  ;;  %s67_s28 = int_to_ptr.vmem [resolvable:$true] %s66_s28 }
  0x31   :  { %59 = dma.vmem_to_smem %s57_s24, 16, %s679_s1, [#allocation9]  }
  0x32   :  { %s654_s29 = scalar_lea.vmem %s67_s28, 16  ;;  %p659_p10 = scmp.lt.s32.totalorder %s67_s28, %s67_s28 }
  0x33   :  { %p655_p9 = scmp.ne.s32.totalorder %s67_s28, %s654_s29  ;;  %p660_p11 = scmp.lt.s32.totalorder %s654_s29, %s654_s29 }
  0x35   :  { %p661_p12 = por %p660_p11, %p659_p10 }
  0x37   :  { %p662_p13 = pnand %p661_p12, %p655_p9 }
  0x39   :  { %665 = shalt.err (!%p662_p13)
}
  0x3a   :  { %s680_s30 = smov [#allocation11]  }
  0x3b   :  { %69 = dma.vmem_to_smem %s67_s28, 16, %s680_s30, [#allocation12]  }
  0x3c   :  { %666 = dma.done.wait [#allocation5], 512  }
  0x3d   :  { %667 = vsyncadd [#allocation5], 4294966784 }
  0x3e   :  { %668 = dma.done.wait [#allocation6], 32  }
  0x3f   :  { %669 = vsyncadd [#allocation6], 4294967264 }
  0x40   :  { %670 = dma.done.wait [#allocation9], 48  }
  0x41   :  { %671 = vsyncadd [#allocation9], 4294967248 }
  0x42   :  { %672 = dma.done.wait [#allocation12], 16  }
  0x43   :  { %673 = vsyncadd [#allocation12], 4294967280 }
  0x44   :  { %89 = sfence }
  0x45   :  { %s90_s4 = sld [smem:[#allocation7]]  ;;  %s556_s8 = sld [smem:[#allocation7 + $0x1]]  ;;  %v105_v0 = vld [vmem:[#allocation4 + $0x8] sm:$0xff]  ;;  %v107_v1 = vld [vmem:[#allocation4 + $0x18] sm:$0xff]  ;;  %v104_v2 = vld [vmem:[#allocation4] sm:$0xff]  ;;  %vm122_vm0 = vcmask 1046528  }
  0x46   :  { %s557_s9 = sld [smem:[#allocation7 + $0x80]]  ;;  %s558_s10 = sld [smem:[#allocation7 + $0x81]]  ;;  %v106_v3 = vld [vmem:[#allocation4 + $0x10] sm:$0xff]  ;;  %vm183_vm1 = vcmask 129024   ;;  %vm181_vm2 = vcmask 130048   ;;  %vm444_vm3 = vcmask 128000  }
  0x47   :  { %s681_s11 = smov 124   ;;  %s98_s21 = sld [smem:[#allocation10]] }
  0x48   :  { %s100_s22 = sld [smem:[#allocation11]]  ;;  %s562_s25 = sld [smem:[#allocation10 + $0x1]] }
  0x49   :  { %s559_s26 = sld [smem:[#allocation8 + $0x1]]  ;;  %s94_s3 = sld [smem:[#allocation8]] }
  0x4a   :  { %s826_s1 = sld [smem:[#allocation11 + $0x1]]  ;;  %s560_s27 = sld [smem:[#allocation8 + $0x80]] }
  0x4b   :  { %v108_v4 = vstv %s90_s4  ;;  %v113_v5 = vstv %s556_s8  ;;  %s561_s29 = sld [smem:[#allocation8 + $0x81]] }
  0x4c   :  { %v110_v6 = vmul.f32 %v108_v4, %v105_v0  ;;  %v115_v7 = vmul.f32 %v113_v5, %v105_v0  ;;  %v112_v8 = vmul.f32 %v108_v4, %v107_v1  ;;  %v117_v9 = vmul.f32 %v113_v5, %v107_v1 }
  0x4d   :  { %v109_v10 = vmul.f32 %v108_v4, %v104_v2  ;;  %v114_v11 = vmul.f32 %v113_v5, %v104_v2  ;;  %v111_v12 = vmul.f32 %v108_v4, %v106_v3  ;;  %v116_v13 = vmul.f32 %v113_v5, %v106_v3 }
  0x4e   :  { %v124_v14 = vrot.slane %v115_v7, 1  ;;  %v127_v15 = vrot.slane %v117_v9, 1  ;;  %v137_v16 = vstv %s557_s9  ;;  %v142_v17 = vstv %s558_s10 }
  0x4f   :  { %v123_v18 = vrot.slane %v114_v11, 1  ;;  %v126_v19 = vrot.slane %v116_v13, 1  ;;  %v143_v20 = vmul.f32 %v142_v17, %v104_v2  ;;  %v138_v23 = vmul.f32 %v137_v16, %v104_v2 }
  0x50   :  { %v746_v21 = vadd.f32 %v124_v14, %v110_v6  ;;  %v748_v22 = vadd.f32 %v127_v15, %v112_v8  ;;  %v144_v24 = vmul.f32 %v142_v17, %v105_v0  ;;  %v139_v28 = vmul.f32 %v137_v16, %v105_v0 }
  0x51   :  { %v125_v25 = vsel %vm122_vm0, %v123_v18, %v124_v14  ;;  %v128_v26 = vsel %vm122_vm0, %v126_v19, %v127_v15  ;;  %v151_v27 = vrot.slane %v143_v20, 1  ;;  %v145_v32 = vmul.f32 %v142_v17, %v106_v3 }
  0x52   :  { %171 = vrot.lane.b32.xlu0 %v746_v21, %s681_s11  ;;  %175 = vrot.lane.b32.xlu1 %v748_v22, %s681_s11  ;;  %v756_v29 = vadd.f32 %v125_v25, %v109_v10  ;;  %v758_v30 = vadd.f32 %v128_v26, %v111_v12  ;;  %v152_v31 = vrot.slane %v144_v24, 1  ;;  %v146_v33 = vmul.f32 %v142_v17, %v107_v1 }
  0x53   :  { %v154_v35 = vrot.slane %v145_v32, 1  ;;  %v140_v36 = vmul.f32 %v137_v16, %v106_v3  ;;  %v141_v40 = vmul.f32 %v137_v16, %v107_v1 }
  0x54   :  { %v153_v34 = vsel %vm122_vm0, %v151_v27, %v152_v31  ;;  %v155_v37 = vrot.slane %v146_v33, 1  ;;  %v767_v39 = vadd.f32 %v152_v31, %v139_v28 }
  0x55   :  { %v765_v38 = vadd.f32 %v153_v34, %v138_v23 }
  0x56   :  { %169 = vrot.lane.b32.xlu0 %v756_v29, %s681_s11  ;;  %173 = vrot.lane.b32.xlu1 %v758_v30, %s681_s11  ;;  %v156_v41 = vsel %vm122_vm0, %v154_v35, %v155_v37  ;;  %v776_v43 = vadd.f32 %v155_v37, %v141_v40 }
  0x57   :  { %v774_v42 = vadd.f32 %v156_v41, %v140_v36 }
  0x5a   :  { %204 = vrot.lane.b32.xlu0 %v765_v38, %s681_s11  ;;  %206 = vrot.lane.b32.xlu1 %v767_v39, %s681_s11 }
  0x5e   :  { %208 = vrot.lane.b32.xlu0 %v774_v42, %s681_s11  ;;  %210 = vrot.lane.b32.xlu1 %v776_v43, %s681_s11 }
  0xc4   :  { %v172_v44 = vpop.permute.xlu0 %171  ;;  %v176_v45 = vpop.permute.xlu1 %175 }
  0xc5   :  { %v184_v48 = vsel %vm183_vm1, %v172_v44, 0.0  ;;  %v188_v55 = vsel %vm183_vm1, %v176_v45, 0.0 }
  0xc8   :  { %v170_v46 = vpop.permute.xlu0 %169  ;;  %v174_v47 = vpop.permute.xlu1 %173 }
  0xc9   :  { %v182_v49 = vsel %vm181_vm2, %v170_v46, 0.0  ;;  %v186_v50 = vsel %vm181_vm2, %v174_v47, 0.0 }
  0xca   :  { %v185_v51 = vadd.f32 %v184_v48, %v182_v49 }
  0xcc   :  { %v187_v52 = vadd.f32 %v186_v50, %v185_v51  ;;  %v205_v53 = vpop.permute.xlu0 %204  ;;  %v207_v54 = vpop.permute.xlu1 %206 }
  0xcd   :  { %v216_v56 = vsel %vm181_vm2, %v205_v53, 0.0  ;;  %v217_v57 = vsel %vm183_vm1, %v207_v54, 0.0 }
  0xce   :  { %v218_v58 = vadd.f32 %v217_v57, %v216_v56  ;;  %v189_v59 = vadd.f32 %v188_v55, %v187_v52 }
  0xd0   :  { %190 = vadd.xlane.f32.xlu0 %v189_v59  ;;  %v209_v60 = vpop.permute.xlu0 %208  ;;  %v211_v61 = vpop.permute.xlu1 %210 }
  0xd1   :  { %v219_v62 = vsel %vm181_vm2, %v209_v60, 0.0  ;;  %v221_v63 = vsel %vm183_vm1, %v211_v61, 0.0 }
  0xd2   :  { %v220_v0 = vadd.f32 %v219_v62, %v218_v58 }
  0xd4   :  { %v222_v1 = vadd.f32 %v221_v63, %v220_v0 }
  0xd6   :  { %223 = vadd.xlane.f32.xlu1 %v222_v1 }
 0x15d   :  { %v191_v2 = vpop.xlane.xlu0 %190 }
 0x15e   :  { %v192_v3 = vrot.slane %v191_v2, 4 }
 0x160   :  { %v193_v4 = vadd.f32 %v192_v3, %v191_v2 }
 0x162   :  { %v194_v5 = vrot.slane %v193_v4, 2 }
 0x163   :  { %v224_v6 = vpop.xlane.xlu1 %223 }
 0x164   :  { %v225_v7 = vrot.slane %v224_v6, 4  ;;  %v195_v8 = vadd.f32 %v194_v5, %v193_v4 }
 0x166   :  { %v226_v9 = vadd.f32 %v225_v7, %v224_v6  ;;  %v196_v10 = vrot.slane %v195_v8, 1 }
 0x168   :  { %v227_v11 = vrot.slane %v226_v9, 2  ;;  %v197_v12 = vadd.f32 %v196_v10, %v195_v8 }
 0x16a   :  { %564 = vpush %v197_v12  ;;  %v228_v13 = vadd.f32 %v227_v11, %v226_v9 }
 0x16c   :  { %v229_v14 = vrot.slane %v228_v13, 1 }
 0x16e   :  { %v230_v15 = vadd.f32 %v229_v14, %v228_v13 }
 0x170   :  { %566 = vpush %v230_v15 }
 0x19b   :  { %s790_s2 = spop %564 }
 0x19c   :  { %s199_s12 = smul.f32 0.0020833334, %s790_s2 }
 0x19e   :  { %v233_v16 = vstv %s199_s12 }
 0x19f   :  { %v235_v17 = vsub.f32 %v746_v21, %v233_v16  ;;  %v234_v18 = vsub.f32 %v756_v29, %v233_v16  ;;  %v237_v23 = vsub.f32 %v748_v22, %v233_v16  ;;  %v236_v24 = vsub.f32 %v758_v30, %v233_v16 }
 0x1a1   :  { %s797_s13 = spop %566  ;;  %v239_v19 = vmul.f32 %v235_v17, %v235_v17  ;;  %v238_v20 = vmul.f32 %v234_v18, %v234_v18  ;;  %v241_v26 = vmul.f32 %v237_v23, %v237_v23  ;;  %v240_v27 = vmul.f32 %v236_v24, %v236_v24 }
 0x1a2   :  { %s232_s14 = smul.f32 0.0020833334, %s797_s13 }
 0x1a3   :  { %248 = vrot.lane.b32.xlu1 %v239_v19, %s681_s11  ;;  %246 = vrot.lane.b32.xlu0 %v238_v20, %s681_s11 }
 0x1a4   :  { %v275_v25 = vstv %s232_s14 }
 0x1a5   :  { %v277_v28 = vsub.f32 %v767_v39, %v275_v25  ;;  %v276_v31 = vsub.f32 %v765_v38, %v275_v25  ;;  %v279_v34 = vsub.f32 %v776_v43, %v275_v25  ;;  %v278_v35 = vsub.f32 %v774_v42, %v275_v25 }
 0x1a7   :  { %252 = vrot.lane.b32.xlu1 %v241_v26, %s681_s11  ;;  %250 = vrot.lane.b32.xlu0 %v240_v27, %s681_s11  ;;  %v281_v32 = vmul.f32 %v277_v28, %v277_v28  ;;  %v280_v33 = vmul.f32 %v276_v31, %v276_v31  ;;  %v283_v36 = vmul.f32 %v279_v34, %v279_v34 }
 0x1a8   :  { %v282_v37 = vmul.f32 %v278_v35, %v278_v35 }
 0x1ab   :  { %290 = vrot.lane.b32.xlu1 %v281_v32, %s681_s11  ;;  %288 = vrot.lane.b32.xlu0 %v280_v33, %s681_s11 }
 0x1af   :  { %294 = vrot.lane.b32.xlu1 %v283_v36, %s681_s11  ;;  %292 = vrot.lane.b32.xlu0 %v282_v37, %s681_s11 }
 0x215   :  { %v249_v40 = vpop.permute.xlu1 %248  ;;  %v247_v41 = vpop.permute.xlu0 %246 }
 0x216   :  { %v259_v44 = vsel %vm183_vm1, %v249_v40, 0.0  ;;  %v258_v45 = vsel %vm181_vm2, %v247_v41, 0.0 }
 0x217   :  { %v260_v46 = vadd.f32 %v259_v44, %v258_v45  ;;  %v395_v44 = vstv %s560_s27  ;;  %v404_v45 = vstv %s561_s29 }
 0x219   :  { %v253_v47 = vpop.permute.xlu1 %252  ;;  %v251_v48 = vpop.permute.xlu0 %250 }
 0x21a   :  { %v261_v49 = vsel %vm181_vm2, %v251_v48, 0.0  ;;  %v263_v51 = vsel %vm183_vm1, %v253_v47, 0.0 }
 0x21b   :  { %v262_v50 = vadd.f32 %v261_v49, %v260_v46 }
 0x21d   :  { %v291_v52 = vpop.permute.xlu1 %290  ;;  %v289_v53 = vpop.permute.xlu0 %288  ;;  %v264_v54 = vadd.f32 %v263_v51, %v262_v50 }
 0x21e   :  { %v301_v55 = vsel %vm183_vm1, %v291_v52, 0.0  ;;  %v300_v56 = vsel %vm181_vm2, %v289_v53, 0.0 }
 0x21f   :  { %265 = vadd.xlane.f32.xlu0 %v264_v54  ;;  %v302_v57 = vadd.f32 %v301_v55, %v300_v56 }
 0x221   :  { %v295_v58 = vpop.permute.xlu1 %294  ;;  %v293_v59 = vpop.permute.xlu0 %292 }
 0x222   :  { %v303_v60 = vsel %vm181_vm2, %v293_v59, 0.0  ;;  %v305_v62 = vsel %vm183_vm1, %v295_v58, 0.0 }
 0x223   :  { %v304_v61 = vadd.f32 %v303_v60, %v302_v57 }
 0x225   :  { %v306_v63 = vadd.f32 %v305_v62, %v304_v61 }
 0x227   :  { %307 = vadd.xlane.f32.xlu1 %v306_v63 }
 0x2ac   :  { %v266_v0 = vpop.xlane.xlu0 %265 }
 0x2ad   :  { %v267_v1 = vrot.slane %v266_v0, 4 }
 0x2af   :  { %v268_v2 = vadd.f32 %v267_v1, %v266_v0 }
 0x2b1   :  { %v269_v3 = vrot.slane %v268_v2, 2 }
 0x2b3   :  { %v270_v4 = vadd.f32 %v269_v3, %v268_v2 }
 0x2b4   :  { %v308_v5 = vpop.xlane.xlu1 %307 }
 0x2b5   :  { %v309_v6 = vrot.slane %v308_v5, 4  ;;  %v271_v7 = vrot.slane %v270_v4, 1 }
 0x2b7   :  { %v310_v8 = vadd.f32 %v309_v6, %v308_v5  ;;  %v272_v9 = vadd.f32 %v271_v7, %v270_v4 }
 0x2b9   :  { %v311_v10 = vrot.slane %v310_v8, 2  ;;  %568 = vpush %v272_v9 }
 0x2bb   :  { %v312_v11 = vadd.f32 %v311_v10, %v310_v8 }
 0x2bd   :  { %v313_v12 = vrot.slane %v312_v11, 1 }
 0x2bf   :  { %v314_v13 = vadd.f32 %v313_v12, %v312_v11 }
 0x2c1   :  { %570 = vpush %v314_v13 }
 0x2ea   :  { %s569_s15 = spop %568 }
 0x2eb   :  { %s274_s16 = smul.f32 0.0020833334, %s569_s15 }
 0x2ed   :  { %s317_s17 = sadd.f32 1e-05, %s274_s16 }
 0x2ef   :  { %v318_v14 = vstv %s317_s17 }
 0x2f0   :  { %590 = vrsqrt.f32 %v318_v14 }
 0x2f2   :  { %s571_s18 = spop %570 }
 0x2f3   :  { %s316_s19 = smul.f32 0.0020833334, %s571_s18 }
 0x2f5   :  { %s324_s20 = sadd.f32 1e-05, %s316_s19 }
 0x2f7   :  { %v325_v15 = vstv %s324_s20 }
 0x2f8   :  { %592 = vrsqrt.f32 %v325_v15 }
 0x2fa   :  { %v591_v16 = vpop.eup %590 }
 0x2fb   :  { %572 = vpush %v591_v16 }
 0x302   :  { %v593_v17 = vpop.eup %592 }
 0x303   :  { %574 = vpush %v593_v17 }
 0x32c   :  { %s573_s23 = spop %572 }
 0x32d   :  { %s321_s24 = smul.f32 %s573_s23, %s98_s21 }
 0x32f   :  { %s322_s0 = smul.f32 %s321_s24, %s199_s12  ;;  %v331_v18 = vstv %s321_s24 }
 0x330   :  { %v332_v19 = vmul.f32 %v331_v18, %v756_v29  ;;  %v333_v20 = vmul.f32 %v331_v18, %v746_v21  ;;  %v334_v23 = vmul.f32 %v331_v18, %v758_v30  ;;  %v335_v24 = vmul.f32 %v331_v18, %v748_v22 }
 0x331   :  { %s323_s28 = ssub.f32 %s100_s22, %s322_s0  ;;  %v372_v29 = vstv %s559_s26  ;;  %v367_v22 = vstv %s94_s3 }
 0x333   :  { %v336_v25 = vstv %s323_s28 }
 0x334   :  { %v337_v26 = vadd.f32 %v336_v25, %v332_v19  ;;  %v338_v27 = vadd.f32 %v336_v25, %v333_v20  ;;  %v339_v28 = vadd.f32 %v336_v25, %v334_v23  ;;  %v340_v31 = vadd.f32 %v336_v25, %v335_v24  ;;  %s575_s30 = spop %574 }
 0x335   :  { %s328_s4 = smul.f32 %s575_s30, %s562_s25 }
 0x336   :  { %v341_v32 = vmul.f32 0.1, %v337_v26  ;;  %v342_v33 = vmul.f32 0.1, %v338_v27  ;;  %v343_v34 = vmul.f32 0.1, %v339_v28 }
 0x337   :  { %v344_v35 = vmul.f32 0.1, %v340_v31  ;;  %s329_s8 = smul.f32 %s328_s4, %s232_s14  ;;  %v349_v21 = vstv %s328_s4 }
 0x338   :  { %v345_v36 = vmax.f32 %v337_v26, %v341_v32  ;;  %v346_v30 = vmax.f32 %v338_v27, %v342_v33  ;;  %v347_v37 = vmax.f32 %v339_v28, %v343_v34  ;;  %v350_v41 = vmul.f32 %v349_v21, %v765_v38 }
 0x339   :  { %v348_v40 = vmax.f32 %v340_v31, %v344_v35  ;;  %s330_s9 = ssub.f32 %s826_s1, %s329_s8  ;;  %v351_v48 = vmul.f32 %v349_v21, %v767_v39  ;;  %v352_v50 = vmul.f32 %v349_v21, %v774_v42  ;;  %v353_v51 = vmul.f32 %v349_v21, %v776_v43 }
 0x33a   :  { %v373_v46 = vmul.f32 %v372_v29, %v345_v36  ;;  %v375_v47 = vmul.f32 %v372_v29, %v347_v37  ;;  %v374_v49 = vmul.f32 %v372_v29, %v346_v30  ;;  %v369_v63 = vmul.f32 %v367_v22, %v346_v30 }
 0x33b   :  { %v354_v52 = vstv %s330_s9  ;;  %v376_v53 = vmul.f32 %v372_v29, %v348_v40  ;;  %v368_v0 = vmul.f32 %v367_v22, %v345_v36  ;;  %v371_v2 = vmul.f32 %v367_v22, %v348_v40 }
 0x33c   :  { %v381_v54 = vrot.slane %v373_v46, 1  ;;  %v384_v55 = vrot.slane %v375_v47, 1  ;;  %v355_v56 = vadd.f32 %v354_v52, %v350_v41  ;;  %v356_v57 = vadd.f32 %v354_v52, %v351_v48 }
 0x33d   :  { %v357_v58 = vadd.f32 %v354_v52, %v352_v50  ;;  %v358_v59 = vadd.f32 %v354_v52, %v353_v51  ;;  %v382_v38 = vrot.slane %v374_v49, 1  ;;  %v385_v60 = vrot.slane %v376_v53, 1 }
 0x33e   :  { %v359_v61 = vmul.f32 0.1, %v355_v56  ;;  %v360_v62 = vmul.f32 0.1, %v356_v57  ;;  %v370_v5 = vmul.f32 %v367_v22, %v347_v37 }
 0x33f   :  { %v361_v39 = vmul.f32 0.1, %v357_v58  ;;  %v383_v1 = vsel %vm122_vm0, %v381_v54, %v382_v38  ;;  %v362_v42 = vmul.f32 0.1, %v358_v59  ;;  %v392_v3 = vadd.f32 %v382_v38, %v369_v63 }
 0x340   :  { %v364_v43 = vmax.f32 %v356_v57, %v360_v62  ;;  %v363_v4 = vmax.f32 %v355_v56, %v359_v61  ;;  %v391_v6 = vadd.f32 %v383_v1, %v368_v0  ;;  %v386_v9 = vsel %vm122_vm0, %v384_v55, %v385_v60 }
 0x341   :  { %v366_v7 = vmax.f32 %v358_v59, %v362_v42  ;;  %v365_v8 = vmax.f32 %v357_v58, %v361_v39  ;;  %v394_v14 = vadd.f32 %v385_v60, %v371_v2  ;;  %v393_v25 = vadd.f32 %v386_v9, %v370_v5 }
 0x342   :  { %v397_v10 = vmul.f32 %v395_v44, %v364_v43  ;;  %v406_v11 = vmul.f32 %v404_v45, %v364_v43  ;;  %v396_v12 = vmul.f32 %v395_v44, %v363_v4  ;;  %v405_v13 = vmul.f32 %v404_v45, %v363_v4 }
 0x343   :  { %v399_v15 = vmul.f32 %v395_v44, %v366_v7  ;;  %v408_v16 = vmul.f32 %v404_v45, %v366_v7  ;;  %v398_v17 = vmul.f32 %v395_v44, %v365_v8  ;;  %v407_v26 = vmul.f32 %v404_v45, %v365_v8 }
 0x344   :  { %v401_v18 = vadd.f32 %v397_v10, %v392_v3  ;;  %v414_v19 = vrot.slane %v406_v11, 1  ;;  %v400_v20 = vadd.f32 %v396_v12, %v391_v6  ;;  %v413_v23 = vrot.slane %v405_v13, 1 }
 0x345   :  { %v417_v24 = vrot.slane %v408_v16, 1  ;;  %v403_v31 = vadd.f32 %v399_v15, %v394_v14  ;;  %v402_v33 = vadd.f32 %v398_v17, %v393_v25  ;;  %v416_v34 = vrot.slane %v407_v26, 1 }
 0x346   :  { %v841_v27 = vadd.f32 %v414_v19, %v401_v18  ;;  %v415_v28 = vsel %vm122_vm0, %v413_v23, %v414_v19 }
 0x347   :  { %v844_v32 = vadd.f32 %v415_v28, %v400_v20  ;;  %v418_v35 = vsel %vm122_vm0, %v416_v34, %v417_v24  ;;  %v851_v29 = vadd.f32 %v417_v24, %v403_v31 }
 0x348   :  { %433 = vrot.lane.b32.xlu1 %v841_v27, %s681_s11  ;;  %v853_v21 = vadd.f32 %v418_v35, %v402_v33 }
 0x349   :  { %431 = vrot.lane.b32.xlu0 %v844_v32, %s681_s11 }
 0x34c   :  { %437 = vrot.lane.b32.xlu1 %v851_v29, %s681_s11 }
 0x34d   :  { %435 = vrot.lane.b32.xlu0 %v853_v21, %s681_s11 }
 0x3ba   :  { %v434_v36 = vpop.permute.xlu1 %433 }
 0x3bb   :  { %v432_v30 = vpop.permute.xlu0 %431  ;;  %v445_v37 = vsel %vm444_vm3, %v434_v36, 0.0 }
 0x3bc   :  { %v443_v22 = vsel %vm181_vm2, %v432_v30, 0.0 }
 0x3bd   :  { %v446_v40 = vadd.f32 %v445_v37, %v443_v22 }
 0x3be   :  { %v438_v41 = vpop.permute.xlu1 %437 }
 0x3bf   :  { %v436_v44 = vpop.permute.xlu0 %435  ;;  %v449_v47 = vsel %vm444_vm3, %v438_v41, 0.0 }
 0x3c0   :  { %v447_v45 = vsel %vm181_vm2, %v436_v44, 0.0 }
 0x3c1   :  { %v448_v46 = vadd.f32 %v447_v45, %v446_v40 }
 0x3c3   :  { %v450_v48 = vadd.f32 %v449_v47, %v448_v46 }
 0x3c5   :  { %451 = vadd.xlane.f32.xlu0 %v450_v48 }
 0x452   :  { %v452_v49 = vpop.xlane.xlu0 %451 }
 0x453   :  { %v453_v50 = vrot.slane %v452_v49, 4 }
 0x455   :  { %v454_v51 = vadd.f32 %v453_v50, %v452_v49 }
 0x457   :  { %v455_v52 = vrot.slane %v454_v51, 2 }
 0x459   :  { %v456_v53 = vadd.f32 %v455_v52, %v454_v51 }
 0x45b   :  { %v457_v54 = vrot.slane %v456_v53, 1 }
 0x45d   :  { %v458_v55 = vadd.f32 %v457_v54, %v456_v53 }
 0x45f   :  { %576 = vpush %v458_v55 }
 0x490   :  { %s863_s10 = spop %576 }
 0x491   :  { %s460_s2 = smul.f32 0.002232143, %s863_s10 }
 0x493   :  { %v461_v56 = vstv %s460_s2 }
 0x494   :  { %v462_v57 = vsub.f32 %v844_v32, %v461_v56  ;;  %v463_v59 = vsub.f32 %v841_v27, %v461_v56  ;;  %v464_v60 = vsub.f32 %v853_v21, %v461_v56  ;;  %v465_v62 = vsub.f32 %v851_v29, %v461_v56 }
 0x496   :  { %v466_v58 = vmul.f32 %v462_v57, %v462_v57  ;;  %v467_v38 = vmul.f32 %v463_v59, %v463_v59  ;;  %v468_v61 = vmul.f32 %v464_v60, %v464_v60  ;;  %v469_v63 = vmul.f32 %v465_v62, %v465_v62 }
 0x498   :  { %474 = vrot.lane.b32.xlu1 %v466_v58, %s681_s11 }
 0x49c   :  { %476 = vrot.lane.b32.xlu1 %v467_v38, %s681_s11 }
 0x4a0   :  { %478 = vrot.lane.b32.xlu1 %v468_v61, %s681_s11 }
 0x4a4   :  { %480 = vrot.lane.b32.xlu1 %v469_v63, %s681_s11 }
 0x50a   :  { %v475_v0 = vpop.permute.xlu1 %474 }
 0x50b   :  { %v486_v2 = vsel %vm181_vm2, %v475_v0, 0.0 }
 0x50e   :  { %v477_v39 = vpop.permute.xlu1 %476 }
 0x50f   :  { %v487_v1 = vsel %vm444_vm3, %v477_v39, 0.0 }
 0x510   :  { %v488_v3 = vadd.f32 %v487_v1, %v486_v2 }
 0x512   :  { %v479_v42 = vpop.permute.xlu1 %478 }
 0x513   :  { %v489_v43 = vsel %vm181_vm2, %v479_v42, 0.0 }
 0x514   :  { %v490_v4 = vadd.f32 %v489_v43, %v488_v3 }
 0x516   :  { %v481_v5 = vpop.permute.xlu1 %480 }
 0x517   :  { %v491_v6 = vsel %vm444_vm3, %v481_v5, 0.0 }
 0x518   :  { %v492_v7 = vadd.f32 %v491_v6, %v490_v4 }
 0x51a   :  { %493 = vadd.xlane.f32.xlu1 %v492_v7 }
 0x5a7   :  { %v494_v8 = vpop.xlane.xlu1 %493 }
 0x5a8   :  { %v495_v9 = vrot.slane %v494_v8, 4 }
 0x5aa   :  { %v496_v10 = vadd.f32 %v495_v9, %v494_v8 }
 0x5ac   :  { %v497_v11 = vrot.slane %v496_v10, 2 }
 0x5ae   :  { %v498_v12 = vadd.f32 %v497_v11, %v496_v10 }
 0x5b0   :  { %v499_v13 = vrot.slane %v498_v12, 1 }
 0x5b2   :  { %v500_v14 = vadd.f32 %v499_v13, %v498_v12 }
 0x5b4   :  { %578 = vpush %v500_v14 }
 0x5e5   :  { %s579_s12 = spop %578 }
 0x5e6   :  { %s502_s13 = smul.f32 0.002232143, %s579_s12 }
 0x5e8   :  { %s503_s14 = sadd.f32 1e-05, %s502_s13 }
 0x5ea   :  { %v504_v15 = vstv %s503_s14 }
 0x5eb   :  { %594 = vrsqrt.f32 %v504_v15 }
 0x5f5   :  { %v595_v16 = vpop.eup %594 }
 0x5f6   :  { %580 = vpush %v595_v16 }
 0x627   :  { %s581_s15 = spop %580 }
 0x628   :  { %s507_s18 = smul.f32 %s581_s15, %s917_s5 }
 0x62a   :  { %s508_s19 = smul.f32 %s507_s18, %s460_s2  ;;  %v510_v17 = vstv %s507_s18 }
 0x62b   :  { %v511_v18 = vmul.f32 %v510_v17, %v844_v32  ;;  %v512_v19 = vmul.f32 %v510_v17, %v841_v27  ;;  %v513_v20 = vmul.f32 %v510_v17, %v853_v21  ;;  %v514_v28 = vmul.f32 %v510_v17, %v851_v29 }
 0x62c   :  { %s509_s22 = ssub.f32 %s918_s6, %s508_s19 }
 0x62e   :  { %v515_v23 = vstv %s509_s22 }
 0x62f   :  { %v517_v24 = vadd.f32 %v515_v23, %v512_v19  ;;  %v516_v25 = vadd.f32 %v515_v23, %v511_v18  ;;  %v518_v26 = vadd.f32 %v515_v23, %v513_v20  ;;  %v519_v30 = vadd.f32 %v515_v23, %v514_v28 }
 0x631   :  { %v521_v31 = vmul.f32 0.1, %v517_v24  ;;  %v520_v33 = vmul.f32 0.1, %v516_v25  ;;  %v522_v36 = vmul.f32 0.1, %v518_v26 }
 0x632   :  { %v523_v27 = vmul.f32 0.1, %v519_v30 }
 0x633   :  { %v525_v34 = vmax.f32 %v517_v24, %v521_v31  ;;  %v524_v35 = vmax.f32 %v516_v25, %v520_v33  ;;  %v526_v32 = vmax.f32 %v518_v26, %v522_v36 }
 0x634   :  { %v527_v21 = vmax.f32 %v519_v30, %v523_v27 }
 0x635   :  { %534 = vrot.lane.b32.xlu1 %v525_v34, %s681_s11  ;;  %532 = vrot.lane.b32.xlu0 %v524_v35, %s681_s11 }
 0x639   :  { %536 = vrot.lane.b32.xlu0 %v526_v32, %s681_s11 }
 0x63d   :  { %538 = vrot.lane.b32.xlu0 %v527_v21, %s681_s11 }
 0x6a7   :  { %v535_v37 = vpop.permute.xlu1 %534  ;;  %v533_v22 = vpop.permute.xlu0 %532 }
 0x6a8   :  { %545 = vst.msk [vmem:[%s919_s7 + $0x8] sm:$0x3f] %vm444_vm3, %v535_v37 }
 0x6a9   :  { %544 = vst.msk [vmem:[%s919_s7] sm:$0xff] %vm181_vm2, %v533_v22 }
 0x6ab   :  { %v537_v29 = vpop.permute.xlu0 %536 }
 0x6ac   :  { %546 = vst.msk [vmem:[%s919_s7 + $0x10] sm:$0xff] %vm181_vm2, %v537_v29 }
 0x6af   :  { %v539_v40 = vpop.permute.xlu0 %538 }
 0x6b0   :  { %547 = vst.msk [vmem:[%s919_s7 + $0x18] sm:$0x3f] %vm444_vm3, %v539_v40 }
 0x6b1   :  { %552 = vsyncpa [#allocation5], 1 }
 0x6b2   :  { %553 = vsyncpa [#allocation6], 1 }
 0x6b3   :  { %554 = vsyncpa [#allocation9], 1 }
 0x6b4   :  { %555 = vsyncpa [#allocation12], 1 }

</bundles_post_ra>
